<compile_context>
chip_gen: v6e
topology: v6e:2x2x1
jax: 0.10.0
libtpu: 0.0.40
codegen_flags: <defaults>
</compile_context>

<pallas_src>
import functools

import jax
import jax.numpy as jnp
from jax import lax
from jax.experimental import pallas as pl
from jax.experimental.pallas import tpu as pltpu


def _basic_conv_kernel(patches_ref, w_ref, gamma_ref, beta_ref, o_ref, *,
                       eps, activation, n_images, p_per_image, valid_np):
    """Fused im2col-matmul + BatchNorm (batch stats, biased var) + optional ReLU.

    patches_ref: (Kp, NPp)    bf16  im2col patches; lane index = n*P + p (batch-major)
    w_ref:       (Cout, Kp)   bf16  conv weight, contraction matches patches
    gamma_ref:   (Cout, 1)    f32   BN affine scale
    beta_ref:    (Cout, 1)    f32   BN affine shift
    o_ref:       (N, Cout, P) f32   NCHW-style output (spatial flattened, lane-dense)
    """
    Cout = o_ref.shape[1]
    NPp = patches_ref.shape[1]

    # ---- Conv: one MXU matmul covering the whole batch (f32 accumulation) ----
    acc = jnp.dot(w_ref[...], patches_ref[...],
                  preferred_element_type=jnp.float32)            # (Cout, NPp)

    # ---- BatchNorm2d (training mode): biased batch stats over (N, H, W) ----
    inv_count = 1.0 / float(valid_np)
    if NPp != valid_np:  # exclude lane padding from the statistics
        lane = lax.broadcasted_iota(jnp.int32, (Cout, NPp), 1)
        valid = lane < valid_np
        acc_v = jnp.where(valid, acc, 0.0)
    else:
        valid = None
        acc_v = acc
    mean = jnp.sum(acc_v, axis=-1, keepdims=True) * inv_count    # (Cout, 1)
    centered = acc - mean                                        # two-pass variance
    if valid is not None:
        centered = jnp.where(valid, centered, 0.0)
    var = jnp.sum(centered * centered, axis=-1, keepdims=True) * inv_count

    scale = gamma_ref[...] * lax.rsqrt(var + eps)                # (Cout, 1)
    shift = beta_ref[...] - mean * scale
    y = acc * jnp.broadcast_to(scale, acc.shape) + jnp.broadcast_to(shift, acc.shape)
    if activation:
        y = jnp.maximum(y, 0.0)

    # ---- Per-image lane-dense stores (P is a multiple of 128 at these shapes) ----
    for n in range(n_images):
        o_ref[n] = y[:, n * p_per_image:(n + 1) * p_per_image]


def basic_conv(x_nchw, weight_oihw, gamma, beta, *,
               stride=(1, 1), padding=(1, 1), eps=1e-5, activation=False):
    """Pallas implementation of BasicConv.forward (NCHW in, NCHW out)."""
    N, Cin, H, W = x_nchw.shape
    Cout, Cin_w, KH, KW = weight_oihw.shape
    assert Cin == Cin_w
    sh, sw = stride
    ph, pw = padding
    Ho = (H + 2 * ph - KH) // sh + 1
    Wo = (W + 2 * pw - KW) // sw + 1
    P = Ho * Wo
    NP = N * P
    K = KH * KW * Cin
    Kp = ((K + 15) // 16) * 16          # bf16-friendly contraction padding
    NPp = ((NP + 127) // 128) * 128     # lane-align the flattened batch*spatial axis

    # ---- im2col in the wrapper (single XLA fusion), bf16, tap-major ----
    # TODO(synk): for production H*W, do the KH*KW taps in-kernel against a
    # VMEM-resident padded input tile (strided pl.ds loads) to avoid the 9x
    # im2col HBM read amplification, and add a grid over N / spatial tiles with
    # dimension_semantics=("parallel", ...) plus a two-phase BN reduction so the
    # v7x megacore (2 TCs, 64 MiB VMEM) is used; the toy shape fits one call.
    xp = jnp.pad(x_nchw.astype(jnp.bfloat16),
                 ((0, 0), (0, 0), (ph, ph), (pw, pw)))
    slabs = []
    for kh in range(KH):
        for kw in range(KW):
            slab = xp[:, :, kh:kh + (Ho - 1) * sh + 1:sh,
                            kw:kw + (Wo - 1) * sw + 1:sw]        # (N, Cin, Ho, Wo)
            # lane = n*P + p (batch-major) so per-image output slices stay contiguous
            slabs.append(jnp.transpose(slab, (1, 0, 2, 3)).reshape(Cin, NP))
    patches = jnp.concatenate(slabs, axis=0)                      # (K, N*P) bf16
    patches = jnp.pad(patches, ((0, Kp - K), (0, NPp - NP)))

    # weight: OIHW -> (Cout, KH*KW*Cin) with the same (kh, kw, ci) ordering.
    w = jnp.transpose(weight_oihw, (0, 2, 3, 1)).reshape(Cout, K)
    w = jnp.pad(w, ((0, 0), (0, Kp - K))).astype(jnp.bfloat16)

    g = gamma.reshape(Cout, 1).astype(jnp.float32)
    b = beta.reshape(Cout, 1).astype(jnp.float32)

    kernel = functools.partial(_basic_conv_kernel, eps=eps, activation=activation,
                               n_images=N, p_per_image=P, valid_np=NP)

    cost = pl.CostEstimate(
        flops=2 * Cout * Kp * NPp,
        transcendentals=Cout,  # per-channel rsqrt
        bytes_accessed=(patches.size * 2 + w.size * 2
                        + (g.size + b.size) * 4 + N * Cout * P * 4),
    )

    # TODO(synk): output could be emitted in bf16 (halves output DMA bytes) if
    # the downstream consumer tolerates it; kept f32 to match nn.BatchNorm2d.
    vmem = pl.BlockSpec(memory_space=pltpu.MemorySpace.VMEM)
    out = pl.pallas_call(
        kernel,
        out_shape=jax.ShapeDtypeStruct((N, Cout, P), jnp.float32),
        in_specs=[vmem, vmem, vmem, vmem],
        out_specs=vmem,
        cost_estimate=cost,
        compiler_params=pltpu.CompilerParams(
            # Safe on v7x's 64 MiB VMEM; raise toward ~96 MiB on v5e/v6e when
            # gridding with larger lane-dense tiles.
            vmem_limit_bytes=32 * 1024 * 1024),
    )(patches, w, g, b)

    return out.reshape(N, Cout, Ho, Wo)  # pure reshape, no transpose


def basic_conv_ref(x_nchw, weight_oihw, gamma, beta, *,
                   stride, padding, eps, activation):
    """Plain-JAX reference with identical semantics, for verification."""
    y = lax.conv_general_dilated(
        x_nchw, weight_oihw, window_strides=stride,
        padding=[(padding[0], padding[0]), (padding[1], padding[1])],
        dimension_numbers=('NCHW', 'OIHW', 'NCHW'))
    mean = jnp.mean(y, axis=(0, 2, 3), keepdims=True)
    var = jnp.mean(jnp.square(y - mean), axis=(0, 2, 3), keepdims=True)
    y = (y - mean) * lax.rsqrt(var + eps)
    y = y * gamma.reshape(1, -1, 1, 1) + beta.reshape(1, -1, 1, 1)
    if activation:
        y = jnp.maximum(y, 0.0)
    return y


if __name__ == "__main__":
    # BasicConv(in_channel=4, out_channel=8, kernel_size=(3,3), stride=(1,1),
    #           padding=(1,1), bias=False, activation=True)
    N, Cin, H, W = 2, 4, 16, 16
    Cout, KH, KW = 8, 3, 3
    stride, padding, eps, activation = (1, 1), (1, 1), 1e-5, True

    key = jax.random.PRNGKey(0)
    kx, kw = jax.random.split(key)
    x = jax.random.normal(kx, (N, Cin, H, W), dtype=jnp.float32)
    weight = jax.random.normal(kw, (Cout, Cin, KH, KW), dtype=jnp.float32) * 0.1
    # Varied BN affine params to exercise the fused scale/shift (nn.BatchNorm2d
    # defaults would be gamma=1, beta=0).
    gamma = 1.0 + 0.1 * jnp.arange(Cout, dtype=jnp.float32)
    beta = 0.05 * jnp.arange(Cout, dtype=jnp.float32) - 0.2
    # TODO(synk): running_mean/running_var buffer updates (side effects of
    # training-mode BN) are not modeled; only the forward output is produced.

    out = basic_conv(x, weight, gamma, beta, stride=stride, padding=padding,
                     eps=eps, activation=activation)
    out = jax.block_until_ready(out)

    # The kernel feeds bf16 operands to the MXU (f32 accumulation). Compare
    # against a reference given the same bf16-rounded inputs so the check is
    # precision-matched; the remaining diff is only f32 accumulation order.
    x_r = x.astype(jnp.bfloat16).astype(jnp.float32)
    w_r = weight.astype(jnp.bfloat16).astype(jnp.float32)
    ref = basic_conv_ref(x_r, w_r, gamma, beta, stride=stride,
                         padding=padding, eps=eps, activation=activation)
    assert out.shape == (N, Cout, H, W)
    assert jnp.allclose(out, ref, rtol=2e-3, atol=2e-3), "mismatch vs reference"

    print("KERNEL_OK")
</pallas_src>

<mosaic_0001>
module attributes {stable_mosaic.version = 11 : i64} {
  func.func @_basic_conv_kernel(%arg0: memref<48x512xbf16, #tpu.memory_space<vmem>>, %arg1: memref<8x48xbf16, #tpu.memory_space<vmem>>, %arg2: memref<8x1xf32, #tpu.memory_space<vmem>>, %arg3: memref<8x1xf32, #tpu.memory_space<vmem>>, %arg4: memref<2x8x256xf32, #tpu.memory_space<vmem>>) attributes {dimension_semantics = [], scalar_prefetch = 0 : i64, scratch_operands = 0 : i64, tpu.core_type = #tpu.core_type<tc>} {
    %c0 = arith.constant 0 : index
    %c0_0 = arith.constant 0 : index
    %0 = vector.load %arg1[%c0, %c0_0] : memref<8x48xbf16, #tpu.memory_space<vmem>>, vector<8x48xbf16>
    %c0_1 = arith.constant 0 : index
    %c0_2 = arith.constant 0 : index
    %1 = vector.load %arg0[%c0_1, %c0_2] : memref<48x512xbf16, #tpu.memory_space<vmem>>, vector<48x512xbf16>
    %cst = arith.constant dense<0.000000e+00> : vector<8x512xf32>
    %2 = tpu.matmul %0, %1, %cst {dimension_numbers = #tpu.dot_dimension_numbers<[1], [0], [0], [1], [0, 0, 1, 1], [], []>} : vector<8x48xbf16>, vector<48x512xbf16>, vector<8x512xf32> -> vector<8x512xf32>
    %cst_3 = arith.constant dense<0.000000e+00> : vector<8xf32>
    %3 = vector.multi_reduction <add>, %2, %cst_3 [1] : vector<8x512xf32> to vector<8xf32>
    %4 = vector.shape_cast %3 : vector<8xf32> to vector<8x1xf32>
    %cst_4 = arith.constant 0.001953125 : f32
    %5 = vector.broadcast %cst_4 : f32 to vector<8x1xf32>
    %6 = arith.mulf %4, %5 : vector<8x1xf32>
    %7 = vector.broadcast %6 : vector<8x1xf32> to vector<8x512xf32>
    %8 = arith.subf %2, %7 : vector<8x512xf32>
    %9 = arith.mulf %8, %8 : vector<8x512xf32>
    %cst_5 = arith.constant dense<0.000000e+00> : vector<8xf32>
    %10 = vector.multi_reduction <add>, %9, %cst_5 [1] : vector<8x512xf32> to vector<8xf32>
    %11 = vector.shape_cast %10 : vector<8xf32> to vector<8x1xf32>
    %cst_6 = arith.constant 0.001953125 : f32
    %12 = vector.broadcast %cst_6 : f32 to vector<8x1xf32>
    %13 = arith.mulf %11, %12 : vector<8x1xf32>
    %c0_7 = arith.constant 0 : index
    %c0_8 = arith.constant 0 : index
    %14 = vector.load %arg2[%c0_7, %c0_8] : memref<8x1xf32, #tpu.memory_space<vmem>>, vector<8x1xf32>
    %cst_9 = arith.constant 9.99999974E-6 : f32
    %15 = vector.broadcast %cst_9 : f32 to vector<8x1xf32>
    %16 = arith.addf %13, %15 : vector<8x1xf32>
    %17 = math.rsqrt %16 : vector<8x1xf32>
    %18 = arith.mulf %14, %17 : vector<8x1xf32>
    %c0_10 = arith.constant 0 : index
    %c0_11 = arith.constant 0 : index
    %19 = vector.load %arg3[%c0_10, %c0_11] : memref<8x1xf32, #tpu.memory_space<vmem>>, vector<8x1xf32>
    %20 = arith.mulf %6, %18 : vector<8x1xf32>
    %21 = arith.subf %19, %20 : vector<8x1xf32>
    %22 = vector.shape_cast %18 : vector<8x1xf32> to vector<8x1xf32>
    %23 = vector.broadcast %22 : vector<8x1xf32> to vector<8x512xf32>
    %24 = arith.mulf %2, %23 : vector<8x512xf32>
    %25 = vector.shape_cast %21 : vector<8x1xf32> to vector<8x1xf32>
    %26 = vector.broadcast %25 : vector<8x1xf32> to vector<8x512xf32>
    %27 = arith.addf %24, %26 : vector<8x512xf32>
    %cst_12 = arith.constant 0.000000e+00 : f32
    %28 = vector.broadcast %cst_12 : f32 to vector<8x512xf32>
    %29 = arith.maximumf %27, %28 : vector<8x512xf32>
    %30 = vector.extract_strided_slice %29 {offsets = [0, 0], sizes = [8, 256], strides = [1, 1]} : vector<8x512xf32> to vector<8x256xf32>
    %c0_13 = arith.constant 0 : index
    %c0_14 = arith.constant 0 : index
    %c0_15 = arith.constant 0 : index
    %31 = vector.load %arg4[%c0_13, %c0_14, %c0_15] : memref<2x8x256xf32, #tpu.memory_space<vmem>>, vector<1x8x256xf32>
    %32 = vector.shape_cast %31 : vector<1x8x256xf32> to vector<8x256xf32>
    %33 = vector.shape_cast %30 : vector<8x256xf32> to vector<1x8x256xf32>
    tpu.vector_store %arg4[%c0_13, %c0_14, %c0_15], %33 {strides = array<i32>} : memref<2x8x256xf32, #tpu.memory_space<vmem>>, vector<1x8x256xf32>,
    %34 = vector.extract_strided_slice %29 {offsets = [0, 256], sizes = [8, 256], strides = [1, 1]} : vector<8x512xf32> to vector<8x256xf32>
    %c1 = arith.constant 1 : index
    %c0_16 = arith.constant 0 : index
    %c0_17 = arith.constant 0 : index
    %35 = vector.load %arg4[%c1, %c0_16, %c0_17] : memref<2x8x256xf32, #tpu.memory_space<vmem>>, vector<1x8x256xf32>
    %36 = vector.shape_cast %35 : vector<1x8x256xf32> to vector<8x256xf32>
    %37 = vector.shape_cast %34 : vector<8x256xf32> to vector<1x8x256xf32>
    tpu.vector_store %arg4[%c1, %c0_16, %c0_17], %37 {strides = array<i32>} : memref<2x8x256xf32, #tpu.memory_space<vmem>>, vector<1x8x256xf32>,
    return
  }
}

</mosaic_0001>

<bundles_post_ra>
// kernel: tpu_custom_call.1
= control target key start
LH: loop header
LB: loop body
LE: loop exit
PB: predicated region body
PF: predicated region fallthrough
CT: control target
= control target key end

     0   :  { %9 = vsyncpa [#allocation3], 0  ;;  %s399_s0 = inlined_call_operand.hbm [shape: bf16[48,512], index: 0, kind: input, shape index: {}]   ;;  %s400_s1 = inlined_call_operand.vmem [shape: bf16[8,48], index: 1, kind: input, shape index: {}]   ;;  %s401_s2 = inlined_call_operand.vmem [shape: f32[8,1], index: 2, kind: input, shape index: {}]   ;;  %s402_s3 = inlined_call_operand.vmem [shape: f32[8,1], index: 3, kind: input, shape index: {}]   ;;  %s403_s4 = inlined_call_operand.hbm [shape: f32[2,8,256], index: 4, kind: output, shape index: {}]  }
   0x1   :  { %10 = vsyncpa [#allocation4], 0  ;;  %s348_s15 = smov [#allocation2]  }
   0x2   :  { %s16_s16 = sshll.u32 %s348_s15, 4  ;;  %s17_s16 = int_to_ptr.vmem [resolvable:$true] %s16_s16 }
   0x3   :  { %s312_s17 = scalar_lea.vmem %s17_s16, 1536  ;;  %p317_p1 = scmp.lt.s32.totalorder %s17_s16, %s17_s16 }
   0x4   :  { %p313_p0 = scmp.ne.s32.totalorder %s17_s16, %s312_s17  ;;  %p318_p2 = scmp.lt.s32.totalorder %s312_s17, %s312_s17 }
   0x6   :  { %p319_p3 = por %p318_p2, %p317_p1 }
   0x8   :  { %p320_p4 = pnand %p319_p3, %p313_p0 }
   0xa   :  { %323 = shalt.err (!%p320_p4)
}
   0xb   :  { %s349_s18 = smov 256   ;;  %s350_s19 = smov 16  }
   0xc   :  { %22 = dma.hbm_to_vmem [thread:$0]  %s399_s0, 1536, %s17_s16, [#allocation3], %s349_s18, %s349_s18, %s350_s19  }
   0xd   :  { %344 = dma.done.wait [#allocation3], 1536  }
   0xe   :  { %345 = vsyncadd [#allocation3], 4294965760  ;;  %v351_v0 = vmov 0   ;;  %v284_v1 = vld [vmem:[#allocation2 + $0x44] ss:$16 sps:$4 sm:$0xff]   ;;  %vm106_vm0 = vcmask 392192  }
   0xf   :  { %142 = vmatprep.mubr.bf16.mxu0 %v351_v0  ;;  %183 = vmatprep.mubr.bf16.mxu1 %v351_v0  ;;  %v286_v2 = vld [vmem:[#allocation2 + $0x4c] ss:$16 sps:$4 sm:$0xff]   ;;  %v288_v3 = vld [vmem:[#allocation2 + $0x40] ss:$16 sps:$4 sm:$0xff]   ;;  %v289_v4 = vld [vmem:[#allocation2 + $0x48] ss:$16 sps:$4 sm:$0xff]  }
  0x10   :  { %282 = vset.pattern.permute.xlu1 %v351_v0  ;;  %283 = vset.pattern.permute.xlu0 %v351_v0  ;;  %v290_v5 = vld [vmem:[#allocation2 + $0x24] ss:$16 sps:$4 sm:$0xff]   ;;  %v292_v6 = vld [vmem:[#allocation2 + $0x2c] ss:$16 sps:$4 sm:$0xff]   ;;  %v294_v7 = vld [vmem:[#allocation2 + $0x20] ss:$16 sps:$4 sm:$0xff]  }
  0x11   :  { %120 = vmatprep.subr.bf16.mxu0 %v284_v1  ;;  %161 = vmatprep.subr.bf16.mxu1 %v286_v2  ;;  %v295_v8 = vld [vmem:[#allocation2 + $0x28] ss:$16 sps:$4 sm:$0xff]   ;;  %v296_v9 = vld [vmem:[#allocation2 + $0x4] ss:$16 sps:$4 sm:$0xff]   ;;  %v298_v10 = vld [vmem:[#allocation2 + $0xc] ss:$16 sps:$4 sm:$0xff]  }
  0x12   :  { %121 = vmatpush1.bf16.msra.mxu0 %v288_v3  ;;  %162 = vmatpush1.bf16.msra.mxu1 %v289_v4  ;;  %v300_v11 = vld [vmem:[#allocation2] ss:$16 sps:$4 sm:$0xff]   ;;  %v301_v12 = vld [vmem:[#allocation2 + $0x8] ss:$16 sps:$4 sm:$0xff]   ;;  %s352_s26 = smov [#allocation5]  }
  0x13   :  { %122 = vmatprep.subr.bf16.mxu0 %v290_v5  ;;  %163 = vmatprep.subr.bf16.mxu1 %v292_v6  ;;  %v33_v13 = vld [vmem:[%s400_s1] sm:$0xf]  ;;  %s251_s27 = sshll.u32 %s352_s26, 4  ;;  %s252_s27 = int_to_ptr.vmem [resolvable:$true] %s251_s27 }
  0x14   :  { %v212_v41 = vld [vmem:[%s401_s2] sm:$0xff]  ;;  %s324_s2 = scalar_lea.vmem %s252_s27, 512  ;;  %p329_p6 = scmp.lt.s32.totalorder %s252_s27, %s252_s27 }
  0x15   :  { %v216_v44 = vld [vmem:[%s402_s3] sm:$0xff]  ;;  %p325_p5 = scmp.ne.s32.totalorder %s252_s27, %s324_s2  ;;  %p330_p7 = scmp.lt.s32.totalorder %s324_s2, %s324_s2 }
  0x16   :  { %123 = vmatpush1.bf16.msra.mxu0 %v294_v7  ;;  %164 = vmatpush1.bf16.msra.mxu1 %v295_v8 }
  0x17   :  { %124 = vmatprep.subr.bf16.mxu0 %v296_v9  ;;  %165 = vmatprep.subr.bf16.mxu1 %v298_v10  ;;  %p331_p8 = por %p330_p7, %p329_p6 }
  0x19   :  { %p332_p9 = pnand %p331_p8, %p325_p5 }
  0x1a   :  { %125 = vmatpush1.bf16.msra.mxu0 %v300_v11  ;;  %166 = vmatpush1.bf16.msra.mxu1 %v301_v12 }
  0x1d   :  { %275 = vmatmul.mubr.msk.bf16.vlgmr.msra.gmra.mxu0 %vm106_vm0, %v33_v13  ;;  %276 = vmatmul.mubr.msk.bf16.vlgmr.msra.gmra.mxu1 %vm106_vm0, %v33_v13 }
  0xdd   :  { %v144_v14 = vpop.f32.mrf.mxu0  ;;  %v185_v15 = vpop.f32.mrf.mxu1 }
  0xdf   :  { %v146_v16 = vpop.f32.mrf.mxu0  ;;  %v187_v17 = vpop.f32.mrf.mxu1 }
  0xe0   :  { %v192_v18 = vadd.f32 %v146_v16, %v144_v14 }
  0xe1   :  { %v148_v19 = vpop.f32.mrf.mxu0  ;;  %v189_v20 = vpop.f32.mrf.mxu1 }
  0xe2   :  { %v193_v21 = vadd.f32 %v192_v18, %v185_v15 }
  0xe3   :  { %v149_v22 = vpop.f32.mrf.mxu0  ;;  %v190_v23 = vpop.f32.mrf.mxu1 }
  0xe4   :  { %v194_v24 = vadd.f32 %v193_v21, %v187_v17 }
  0xe6   :  { %195 = vadd.xlane.f32.xlu0 %v194_v24 }
 0x16f   :  { %v196_v25 = vpop.xlane.xlu0 %195 }
 0x170   :  { %v197_v26 = vmul.f32 0.001953125, %v196_v25 }
 0x172   :  { %v198_v27 = vsub.f32 %v144_v14, %v197_v26  ;;  %v199_v28 = vsub.f32 %v146_v16, %v197_v26  ;;  %v200_v29 = vsub.f32 %v185_v15, %v197_v26  ;;  %v201_v30 = vsub.f32 %v187_v17, %v197_v26 }
 0x174   :  { %v202_v31 = vmul.f32 %v198_v27, %v198_v27  ;;  %v203_v32 = vmul.f32 %v199_v28, %v199_v28  ;;  %v204_v33 = vmul.f32 %v200_v29, %v200_v29  ;;  %v205_v35 = vmul.f32 %v201_v30, %v201_v30 }
 0x176   :  { %v206_v34 = vadd.f32 %v203_v32, %v202_v31 }
 0x178   :  { %v207_v36 = vadd.f32 %v206_v34, %v204_v33 }
 0x17a   :  { %v208_v37 = vadd.f32 %v207_v36, %v205_v35 }
 0x17c   :  { %209 = vadd.xlane.f32.xlu0 %v208_v37 }
 0x205   :  { %v210_v38 = vpop.xlane.xlu0 %209 }
 0x206   :  { %v211_v39 = vmul.f32 0.001953125, %v210_v38 }
 0x208   :  { %v213_v40 = vadd.f32 1e-05, %v211_v39 }
 0x20a   :  { %302 = vrsqrt.f32 %v213_v40 }
 0x217   :  { %v303_v42 = vpop.eup %302 }
 0x218   :  { %v215_v43 = vmul.f32 %v303_v42, %v212_v41 }
 0x21a   :  { %221 = vperm.xlu1 %282, %v215_v43   ;;  %v217_v45 = vmul.f32 %v215_v43, %v197_v26 }
 0x21c   :  { %v218_v46 = vsub.f32 %v216_v44, %v217_v45 }
 0x21e   :  { %230 = vperm.xlu1 %282, %v218_v46  }
 0x295   :  { %v222_v47 = vpop.permute.xlu1 %221 }
 0x296   :  { %v224_v48 = vmul.f32 %v222_v47, %v144_v14  ;;  %v225_v49 = vmul.f32 %v222_v47, %v146_v16  ;;  %v226_v50 = vmul.f32 %v222_v47, %v185_v15  ;;  %v227_v51 = vmul.f32 %v222_v47, %v187_v17 }
 0x299   :  { %v231_v52 = vpop.permute.xlu1 %230 }
 0x29a   :  { %v233_v53 = vadd.f32 %v231_v52, %v224_v48  ;;  %v234_v54 = vadd.f32 %v231_v52, %v225_v49  ;;  %v235_v55 = vadd.f32 %v231_v52, %v226_v50  ;;  %v236_v56 = vadd.f32 %v231_v52, %v227_v51 }
 0x29c   :  { %v237_v57 = vmax.f32 %v233_v53, 0.0  ;;  %v238_v58 = vmax.f32 %v234_v54, 0.0  ;;  %v239_v59 = vmax.f32 %v235_v55, 0.0  ;;  %v240_v60 = vmax.f32 %v236_v56, 0.0 }
 0x29e   :  { %241 = vst [vmem:[#allocation5] sm:$0xff] %v237_v57  ;;  %242 = vst [vmem:[#allocation5 + $0x8] sm:$0xff] %v238_v58 }
 0x29f   :  { %244 = vst [vmem:[#allocation5 + $0x10] sm:$0xff] %v239_v59  ;;  %245 = vst [vmem:[#allocation5 + $0x18] sm:$0xff] %v240_v60 }
 0x2a0   :  { %335 = shalt.err (!%p332_p9)
}
 0x2a1   :  { %257 = dma.vmem_to_hbm [thread:$0]  %s252_s27, 512, %s403_s4, [#allocation4], %s349_s18, %s349_s18, %s350_s19  }
 0x2a2   :  { %346 = dma.done.wait [#allocation4], 512  }
 0x2a3   :  { %347 = vsyncadd [#allocation4], 4294966784 }
 0x2a4   :  { %261 = vsyncpa [#allocation3], 1 }
 0x2a5   :  { %262 = vsyncpa [#allocation4], 1 }

</bundles_post_ra>
